<compile_context>
chip_gen: v7x
topology: tpu7x:2x2x1
jax: 0.10.0
libtpu: 0.0.40
codegen_flags: <defaults>
</compile_context>

<pallas_src>
import functools

import jax
import jax.numpy as jnp
from jax import lax
from jax.experimental import pallas as pl
from jax.experimental.pallas import tpu as pltpu


def _round_up(x, m):
    return (x + m - 1) // m * m


def _cdiv(a, b):
    return -(-a // b)


# ---------------------------------------------------------------------------
# Kernels
# ---------------------------------------------------------------------------

def _ssm_kernel_compact(x_ref, w_ref, b_ref, n_ref, out_ref, *, stoc_sz):
    """Compact path (3*stoc_sz <= 128): single 128-lane output block.

    Weight/bias are packed so y = relu(x @ W + b) has
      y[:,   0:128] = [ mean(0:S) | mean(0:S) | dev(0:S) | 0 ... ]
      y[:, 128:256] = [ dev(0:S)  | 0 ... ]
    so [sample | mean | dev+1e-6 | 0...] is assembled with per-lane selects only
    (no cross-lane shuffles, no concatenate temp) and stored with one unmasked
    full-lane (tb, 128) store.
    """
    s = stoc_sz
    y = jnp.dot(x_ref[...], w_ref[...],
                preferred_element_type=jnp.float32,
                precision=lax.Precision.HIGHEST)
    y = jnp.maximum(y + b_ref[...], 0.0)

    m0 = y[:, :128]          # mean | mean | dev | 0
    d0 = y[:, 128:]          # dev  | 0   (dev aligned with the sample lanes)

    lane = lax.broadcasted_iota(jnp.int32, m0.shape, 1)
    samp = m0 + (d0 + 1e-6) * n_ref[...]                       # valid on lanes [0, S)
    eps = jnp.where((lane >= 2 * s) & (lane < 3 * s), 1e-6, 0.0)
    out_ref[...] = jnp.where(lane < s, samp, m0 + eps).astype(out_ref.dtype)


def _ssm_kernel_wide(x_ref, w_ref, b_ref, n_ref, out_ref, *, sp):
    """General path: mean/dev each occupy an sp-wide (128-aligned) lane block;
    output is [sample | mean | dev] written with three 128-aligned slice stores."""
    y = jnp.dot(x_ref[...], w_ref[...],
                preferred_element_type=jnp.float32,
                precision=lax.Precision.HIGHEST)
    y = jnp.maximum(y + b_ref[...], 0.0)
    mean = y[:, :sp]
    dev = y[:, sp:] + 1e-6
    out_ref[:, 0:sp] = (mean + dev * n_ref[...]).astype(out_ref.dtype)
    out_ref[:, sp:2 * sp] = mean.astype(out_ref.dtype)
    out_ref[:, 2 * sp:3 * sp] = dev.astype(out_ref.dtype)


# ---------------------------------------------------------------------------
# Wrapper
# ---------------------------------------------------------------------------

@functools.partial(jax.jit, static_argnames=("stoc_sz",))
def _ssm_apply(rng_key, x, w_packed, b_packed, *, stoc_sz):
    """Pad batch -> fused Pallas kernel -> slice.  One dispatched executable per step."""
    b_rows, din = x.shape
    wcols = w_packed.shape[1]
    compact = (3 * stoc_sz) <= 128
    sp = _round_up(max(stoc_sz, 1), 128)

    # Batch tiling: sublane-multiple rows, <=1024-row tiles, <8 rows padding waste,
    # >=2 tiles when batch > 8 so the parallel axis spans both v7x TensorCores.
    b8 = _round_up(max(b_rows, 1), 8)
    if b8 <= 8:
        tb, nb = b8, 1
    else:
        nb = max(2, _cdiv(b8, 1024))
        tb = _round_up(_cdiv(b8, nb), 8)
        nb = _cdiv(b8, tb)
    b_pad = tb * nb

    x = x.astype(jnp.float32)
    if b_pad != b_rows:
        x = jnp.pad(x, ((0, b_pad - b_rows), (0, 0)))

    n_cols = 128 if compact else sp
    # TODO(synk): draw noise from the in-kernel hardware PRNG (pltpu.prng_seed /
    # prng_random_bits) when CPU/interpret compatibility is not required — that
    # removes this XLA RNG op and its HBM round-trip entirely.
    noise = jax.random.normal(rng_key, (b_pad, n_cols), jnp.float32)

    out_cols = 128 if compact else 3 * sp
    kernel = (functools.partial(_ssm_kernel_compact, stoc_sz=stoc_sz) if compact
              else functools.partial(_ssm_kernel_wide, sp=sp))

    out = pl.pallas_call(
        kernel,
        out_shape=jax.ShapeDtypeStruct((b_pad, out_cols), jnp.float32),
        grid=(nb,),
        in_specs=[
            pl.BlockSpec((tb, din), lambda i: (i, 0)),        # x tile
            pl.BlockSpec((din, wcols), lambda i: (0, 0)),     # packed weight (const)
            pl.BlockSpec((1, wcols), lambda i: (0, 0)),       # packed bias (const)
            pl.BlockSpec((tb, n_cols), lambda i: (i, 0)),     # noise tile
        ],
        out_specs=pl.BlockSpec((tb, out_cols), lambda i: (i, 0)),
        compiler_params=pltpu.CompilerParams(
            dimension_semantics=("parallel",),                # batch tiles -> both TCs
        ),
    )(x, w_packed, b_packed, noise)

    s = stoc_sz
    if compact:
        sample = out[:b_rows, 0:s]
        mean = out[:b_rows, s:2 * s]
        dev = out[:b_rows, 2 * s:3 * s]
    else:
        sample = out[:b_rows, 0:s]
        mean = out[:b_rows, sp:sp + s]
        dev = out[:b_rows, 2 * sp:2 * sp + s]
    return sample, mean, dev


class SSM:
    """JAX/Pallas port of the PyTorch SSM module (forward pass)."""

    def __init__(self, det_sz, stoc_sz, feature_sz, key):
        self.det_sz = det_sz
        self.stoc_sz = stoc_sz
        self.feature_sz = feature_sz
        self.compact = (3 * stoc_sz) <= 128
        self.sp = _round_up(max(stoc_sz, 1), 128)

        k1, k2, k3, k4 = jax.random.split(key, 4)

        def _init_linear(kw, kb, fan_in, fan_out):
            bound = 1.0 / float(fan_in) ** 0.5
            w = jax.random.uniform(kw, (fan_out, fan_in), jnp.float32, -bound, bound)
            b = jax.random.uniform(kb, (fan_out,), jnp.float32, -bound, bound)
            return w, b

        # Torch-layout parameters (kept for reference checks): W (2S, Din), b (2S,)
        self.fc1_w, self.fc1_b = _init_linear(k1, k2, det_sz, 2 * stoc_sz)
        self.fc2_w, self.fc2_b = _init_linear(k3, k4, det_sz + feature_sz, 2 * stoc_sz)

        # Lane-aligned packed parameters for the fused kernel.
        self.fc1_w_packed, self.fc1_b_packed = self._pack(self.fc1_w, self.fc1_b)
        self.fc2_w_packed, self.fc2_b_packed = self._pack(self.fc2_w, self.fc2_b)

    def _pack(self, w, b):
        """Pack torch-layout (2S, Din) weights into the kernel's lane layout."""
        S = self.stoc_sz
        din = w.shape[1]
        w_mean, w_dev = w[:S].T, w[S:].T          # (din, S) each
        b_mean, b_dev = b[:S], b[S:]
        if self.compact:
            # Block 0 (lanes 0..127): mean | mean(dup) | dev | 0 ; block 1: dev | 0.
            wp = jnp.zeros((din, 256), jnp.float32)
            wp = wp.at[:, 0:S].set(w_mean)
            wp = wp.at[:, S:2 * S].set(w_mean)
            wp = wp.at[:, 2 * S:3 * S].set(w_dev)
            wp = wp.at[:, 128:128 + S].set(w_dev)
            bp = jnp.zeros((1, 256), jnp.float32)
            bp = bp.at[0, 0:S].set(b_mean)
            bp = bp.at[0, S:2 * S].set(b_mean)
            bp = bp.at[0, 2 * S:3 * S].set(b_dev)
            bp = bp.at[0, 128:128 + S].set(b_dev)
        else:
            sp = self.sp
            wp = jnp.zeros((din, 2 * sp), jnp.float32)
            wp = wp.at[:, :S].set(w_mean)
            wp = wp.at[:, sp:sp + S].set(w_dev)
            bp = jnp.zeros((1, 2 * sp), jnp.float32)
            bp = bp.at[0, :S].set(b_mean)
            bp = bp.at[0, sp:sp + S].set(b_dev)
        return wp, bp

    def __call__(self, det_state, obs_feat=None, *, rng_key):
        squeeze_out = det_state.ndim == 1
        x = det_state[None, :] if squeeze_out else det_state

        if obs_feat is None:
            w, b = self.fc1_w_packed, self.fc1_b_packed
        else:
            feat = jnp.squeeze(obs_feat)
            feat = feat[None, :] if feat.ndim == 1 else feat
            x = jnp.concatenate((x, feat), axis=1)
            w, b = self.fc2_w_packed, self.fc2_b_packed

        sample, mean, dev = _ssm_apply(rng_key, x, w, b, stoc_sz=self.stoc_sz)

        if squeeze_out:
            sample, mean, dev = sample[0], mean[0], dev[0]
        return sample, mean, dev


def _ref_mean_dev(x, w, b, stoc_sz):
    """Plain-JAX reference for the deterministic part (torch-layout W, b)."""
    y = jnp.maximum(jnp.dot(x, w.T, precision=lax.Precision.HIGHEST) + b, 0.0)
    return y[:, :stoc_sz], y[:, stoc_sz:] + 1e-6


if __name__ == "__main__":
    det_sz, stoc_sz, feature_sz = 32, 16, 16
    batch = 2

    key = jax.random.PRNGKey(0)
    k_param, k_det, k_feat, k_n1, k_n2 = jax.random.split(key, 5)

    ssm = SSM(det_sz, stoc_sz, feature_sz, k_param)

    det_state = jax.random.normal(k_det, (batch, det_sz), jnp.float32)
    obs_feat = jax.random.normal(k_feat, (batch, 1, feature_sz), jnp.float32)

    # Prior branch (fc1) and posterior branch (fc2 over concat(det, obs_feat)).
    prior = jax.block_until_ready(ssm(det_state, None, rng_key=k_n1))
    post = jax.block_until_ready(ssm(det_state, obs_feat, rng_key=k_n2))

    def _check(outs, x, w, b):
        sample, mean, dev = outs
        m_ref, d_ref = _ref_mean_dev(x, w, b, stoc_sz)
        assert sample.shape == mean.shape == dev.shape == (batch, stoc_sz)
        assert jnp.allclose(mean, m_ref, atol=1e-5, rtol=1e-5)
        assert jnp.allclose(dev, d_ref, atol=1e-5, rtol=1e-5)
        # Noise only has its distribution specified (torch.randn_like): check the
        # sample is a finite, plausible reparameterized draw around mean.
        assert bool(jnp.all(jnp.isfinite(sample)))
        assert bool(jnp.all(jnp.abs(sample - m_ref) <= 12.0 * d_ref + 1e-3))

    _check(prior, det_state, ssm.fc1_w, ssm.fc1_b)

    x_post = jnp.concatenate((det_state, jnp.squeeze(obs_feat)), axis=1)
    _check(post, x_post, ssm.fc2_w, ssm.fc2_b)

    print("KERNEL_OK")
</pallas_src>

<mosaic_0001>
module attributes {stable_mosaic.version = 11 : i64} {
  func.func @_ssm_kernel_compact(%arg0: i32, %arg1: memref<8x32xf32, #tpu.memory_space<vmem>>, %arg2: memref<32x256xf32, #tpu.memory_space<vmem>>, %arg3: memref<1x256xf32, #tpu.memory_space<vmem>>, %arg4: memref<8x128xf32, #tpu.memory_space<vmem>>, %arg5: memref<8x128xf32, #tpu.memory_space<vmem>>) attributes {dimension_semantics = [#tpu.dimension_semantics<parallel>], iteration_bounds = array<i64: 1>, scalar_prefetch = 0 : i64, scratch_operands = 0 : i64, tpu.core_type = #tpu.core_type<tc>, window_params = [{transform_indices = @transform_0, window_bounds = array<i64: 8, 32>}, {pipeline_mode = #tpu.pipeline_mode<synchronous>, transform_indices = @transform_1, window_bounds = array<i64: 32, 256>}, {pipeline_mode = #tpu.pipeline_mode<synchronous>, transform_indices = @transform_2, window_bounds = array<i64: 1, 256>}, {transform_indices = @transform_3, window_bounds = array<i64: 8, 128>}, {transform_indices = @transform_4, window_bounds = array<i64: 8, 128>}]} {
    %c0 = arith.constant 0 : index
    %c0_0 = arith.constant 0 : index
    %0 = vector.load %arg1[%c0, %c0_0] : memref<8x32xf32, #tpu.memory_space<vmem>>, vector<8x32xf32>
    %c0_1 = arith.constant 0 : index
    %c0_2 = arith.constant 0 : index
    %1 = vector.load %arg2[%c0_1, %c0_2] : memref<32x256xf32, #tpu.memory_space<vmem>>, vector<32x256xf32>
    %cst = arith.constant dense<0.000000e+00> : vector<8x256xf32>
    %2 = tpu.matmul %0, %1, %cst {dimension_numbers = #tpu.dot_dimension_numbers<[1], [0], [0], [1], [0, 0, 1, 1], [], []>, precision = #tpu.contract_precision<fp32>} : vector<8x32xf32>, vector<32x256xf32>, vector<8x256xf32> -> vector<8x256xf32>
    %c0_3 = arith.constant 0 : index
    %c0_4 = arith.constant 0 : index
    %3 = vector.load %arg3[%c0_3, %c0_4] : memref<1x256xf32, #tpu.memory_space<vmem>>, vector<1x256xf32>
    %4 = vector.broadcast %3 : vector<1x256xf32> to vector<8x256xf32>
    %5 = arith.addf %2, %4 : vector<8x256xf32>
    %cst_5 = arith.constant 0.000000e+00 : f32
    %6 = vector.broadcast %cst_5 : f32 to vector<8x256xf32>
    %7 = arith.maximumf %5, %6 : vector<8x256xf32>
    %8 = vector.extract_strided_slice %7 {offsets = [0, 0], sizes = [8, 128], strides = [1, 1]} : vector<8x256xf32> to vector<8x128xf32>
    %9 = vector.extract_strided_slice %7 {offsets = [0, 128], sizes = [8, 128], strides = [1, 1]} : vector<8x256xf32> to vector<8x128xf32>
    %10 = tpu.iota {dimensions = array<i32: 1>} : vector<8x128xi32>
    %cst_6 = arith.constant 9.99999997E-7 : f32
    %11 = vector.broadcast %cst_6 : f32 to vector<8x128xf32>
    %12 = arith.addf %9, %11 : vector<8x128xf32>
    %c0_7 = arith.constant 0 : index
    %c0_8 = arith.constant 0 : index
    %13 = vector.load %arg4[%c0_7, %c0_8] : memref<8x128xf32, #tpu.memory_space<vmem>>, vector<8x128xf32>
    %14 = arith.mulf %12, %13 : vector<8x128xf32>
    %15 = arith.addf %8, %14 : vector<8x128xf32>
    %c32_i32 = arith.constant 32 : i32
    %16 = vector.broadcast %c32_i32 : i32 to vector<8x128xi32>
    %17 = arith.cmpi sge, %10, %16 : vector<8x128xi32>
    %c48_i32 = arith.constant 48 : i32
    %18 = vector.broadcast %c48_i32 : i32 to vector<8x128xi32>
    %19 = arith.cmpi slt, %10, %18 : vector<8x128xi32>
    %20 = arith.andi %17, %19 : vector<8x128xi1>
    %cst_9 = arith.constant 9.99999997E-7 : f32
    %cst_10 = arith.constant 0.000000e+00 : f32
    %21 = vector.broadcast %cst_9 : f32 to vector<8x128xf32>
    %22 = vector.broadcast %cst_10 : f32 to vector<8x128xf32>
    %23 = arith.select %20, %21, %22 : vector<8x128xi1>, vector<8x128xf32>
    %c16_i32 = arith.constant 16 : i32
    %24 = vector.broadcast %c16_i32 : i32 to vector<8x128xi32>
    %25 = arith.cmpi slt, %10, %24 : vector<8x128xi32>
    %26 = arith.addf %8, %23 : vector<8x128xf32>
    %27 = arith.select %25, %15, %26 : vector<8x128xi1>, vector<8x128xf32>
    %c0_11 = arith.constant 0 : index
    %c0_12 = arith.constant 0 : index
    %28 = vector.load %arg5[%c0_11, %c0_12] : memref<8x128xf32, #tpu.memory_space<vmem>>, vector<8x128xf32>
    tpu.vector_store %arg5[%c0_11, %c0_12], %27 {strides = array<i32>} : memref<8x128xf32, #tpu.memory_space<vmem>>, vector<8x128xf32>,
    return
  }
  func.func @transform_0(%arg0: i32) -> (i32, i32) {
    %c0_i32 = arith.constant 0 : i32
    %c0_i32_0 = arith.constant 0 : i32
    return %arg0, %c0_i32 : i32, i32
  }
  func.func @transform_1(%arg0: i32) -> (i32, i32) {
    %c0_i32 = arith.constant 0 : i32
    %c0_i32_0 = arith.constant 0 : i32
    %c0_i32_1 = arith.constant 0 : i32
    return %c0_i32, %c0_i32_0 : i32, i32
  }
  func.func @transform_2(%arg0: i32) -> (i32, i32) {
    %c0_i32 = arith.constant 0 : i32
    %c0_i32_0 = arith.constant 0 : i32
    %c0_i32_1 = arith.constant 0 : i32
    return %c0_i32, %c0_i32_0 : i32, i32
  }
  func.func @transform_3(%arg0: i32) -> (i32, i32) {
    %c0_i32 = arith.constant 0 : i32
    %c0_i32_0 = arith.constant 0 : i32
    return %arg0, %c0_i32 : i32, i32
  }
  func.func @transform_4(%arg0: i32) -> (i32, i32) {
    %c0_i32 = arith.constant 0 : i32
    %c0_i32_0 = arith.constant 0 : i32
    return %arg0, %c0_i32 : i32, i32
  }
}

</mosaic_0001>

<bundles_post_ra>
// kernel: _ssm_apply.1
= control target key start
LH: loop header
LB: loop body
LE: loop exit
PB: predicated region body
PF: predicated region fallthrough
CT: control target
= control target key end

     0   :  { %v666_v3 = vmov 0.0   ;;  %vm38_vm0 = vcmask 261120   ;;  %s802_s1 = inlined_call_operand.vmem [shape: f32[32,256], index: 1, kind: input, shape index: {}]   ;;  %s803_s0 = inlined_call_operand.vmem [shape: f32[8,32], index: 0, kind: input, shape index: {}]   ;;  %s804_s2 = inlined_call_operand.vmem [shape: f32[1,256], index: 2, kind: input, shape index: {}]   ;;  %s805_s3 = inlined_call_operand.vmem [shape: f32[8,128], index: 3, kind: input, shape index: {}]   ;;  %s806_s4 = inlined_call_operand.vmem [shape: f32[8,128], index: 4, kind: output, shape index: {}]  }
   0x1   :  { %v19_v0 = vld [vmem:[%s802_s1 + $0x8] sm:$0xff]  ;;  %v21_v1 = vld [vmem:[%s802_s1 + $0x18] sm:$0xff]  ;;  %v18_v2 = vld [vmem:[%s802_s1] sm:$0xff]  ;;  %114 = vmatprep.mubr.f32.mxu1 %v666_v3  ;;  %399 = vmatprep.mubr.f32.mxu0 %v666_v3 }
   0x2   :  { %v42_v4 = vand.u32 4294901760, %v19_v0  ;;  %v46_v5 = vand.u32 4294901760, %v21_v1  ;;  %v20_v6 = vld [vmem:[%s802_s1 + $0x10] sm:$0xff]  ;;  %v44_v7 = vand.u32 4294901760, %v18_v2  ;;  %v23_v8 = vld [vmem:[%s802_s1 + $0x28] sm:$0xff]  ;;  %v25_v9 = vld [vmem:[%s802_s1 + $0x38] sm:$0xff] }
   0x3   :  { %v48_v10 = vand.u32 4294901760, %v20_v6  ;;  %v50_v11 = vand.u32 4294901760, %v23_v8  ;;  %v54_v12 = vand.u32 4294901760, %v25_v9  ;;  %v22_v13 = vld [vmem:[%s802_s1 + $0x20] sm:$0xff]  ;;  %v24_v14 = vld [vmem:[%s802_s1 + $0x30] sm:$0xff] }
   0x4   :  { %v17_v15 = vld [vmem:[%s803_s0] sm:$0xff]  ;;  %v721_v16 = vpack.c.bf16 %v46_v5, %v42_v4  ;;  %v723_v17 = vsub.f32 %v19_v0, %v42_v4  ;;  %v725_v18 = vsub.f32 %v21_v1, %v46_v5  ;;  %v727_v19 = vsub.f32 %v18_v2, %v44_v7 }
   0x5   :  { %v729_v20 = vpack.c.bf16 %v48_v10, %v44_v7  ;;  %v731_v21 = vsub.f32 %v20_v6, %v48_v10  ;;  %v733_v22 = vpack.c.bf16 %v54_v12, %v50_v11  ;;  %v735_v23 = vsub.f32 %v23_v8, %v50_v11 }
   0x6   :  { %606 = vmatprep.subr.bf16.mxu1 %v721_v16  ;;  %630 = vmatprep.subr.bf16.mxu0 %v721_v16  ;;  %v739_v24 = vsub.f32 %v25_v9, %v54_v12  ;;  %v52_v25 = vand.u32 4294901760, %v22_v13  ;;  %v56_v26 = vand.u32 4294901760, %v24_v14  ;;  %v40_v27 = vsel %vm38_vm0, %v17_v15, 0  ;;  %v26_v12 = vld [vmem:[%s804_s2] sm:$0x3] }
   0x7   :  { %608 = vmatpush1.bf16.msra.mxu1 %v729_v20  ;;  %632 = vmatpush1.bf16.msra.mxu0 %v729_v20  ;;  %v744_v28 = vand.u32 4294901760, %v40_v27  ;;  %v128_v29 = vand.u32 4294901760, %v723_v17  ;;  %v140_v30 = vand.u32 4294901760, %v725_v18  ;;  %v134_v31 = vand.u32 4294901760, %v727_v19 }
   0x8   :  { %610 = vmatprep.subr.bf16.mxu1 %v733_v22  ;;  %634 = vmatprep.subr.bf16.mxu0 %v733_v22  ;;  %v751_v32 = vpack.c.bf16 %v56_v26, %v52_v25  ;;  %v753_v33 = vsub.f32 %v22_v13, %v52_v25  ;;  %v755_v34 = vsub.f32 %v24_v14, %v56_v26  ;;  %v146_v35 = vand.u32 4294901760, %v731_v21  ;;  %v590_v26 = vld [vmem:[%s805_s3] sm:$0xff] }
   0x9   :  { %v116_v36 = vsub.f32 %v40_v27, %v744_v28  ;;  %v129_v37 = vsub.f32 %v723_v17, %v128_v29  ;;  %v141_v38 = vsub.f32 %v725_v18, %v140_v30  ;;  %v637_v39 = vpack.c.bf16 %v140_v30, %v128_v29 }
   0xa   :  { %v135_v40 = vsub.f32 %v727_v19, %v134_v31  ;;  %v147_v41 = vsub.f32 %v731_v21, %v146_v35  ;;  %v639_v42 = vpack.c.bf16 %v146_v35, %v134_v31  ;;  %v152_v43 = vand.u32 4294901760, %v735_v23 }
   0xb   :  { %612 = vmatpush1.bf16.msra.mxu1 %v751_v32  ;;  %636 = vmatpush1.bf16.msra.mxu0 %v751_v32  ;;  %v117_v44 = vand.u32 4294901760, %v116_v36  ;;  %v130_v45 = vand.u32 4294901760, %v129_v37  ;;  %v142_v46 = vand.u32 4294901760, %v141_v38  ;;  %v164_v47 = vand.u32 4294901760, %v739_v24 }
   0xc   :  { %638 = vmatprep.subr.bf16.mxu0 %v637_v39  ;;  %v136_v48 = vand.u32 4294901760, %v135_v40  ;;  %v148_v49 = vand.u32 4294901760, %v147_v41  ;;  %v153_v50 = vsub.f32 %v735_v23, %v152_v43  ;;  %v158_v51 = vand.u32 4294901760, %v753_v33 }
   0xd   :  { %v118_v52 = vsub.f32 %v116_v36, %v117_v44  ;;  %v613_v53 = vpack.c.bf16 %v142_v46, %v130_v45  ;;  %v165_v54 = vsub.f32 %v739_v24, %v164_v47  ;;  %v641_v55 = vpack.c.bf16 %v164_v47, %v152_v43 }
   0xe   :  { %403 = vmatmul.mubr.f32.vlgmr.msra.gmra.mrb[0].mxu0 %v117_v44  ;;  %v615_v56 = vpack.c.bf16 %v148_v49, %v136_v48  ;;  %v154_v57 = vand.u32 4294901760, %v153_v50  ;;  %v159_v58 = vsub.f32 %v753_v33, %v158_v51  ;;  %v170_v59 = vand.u32 4294901760, %v755_v34 }
   0xf   :  { %v119_v60 = vand.u32 4294901760, %v118_v52  ;;  %614 = vmatprep.subr.bf16.mxu1 %v613_v53  ;;  %640 = vmatpush1.bf16.msra.mxu0 %v639_v42  ;;  %v166_v61 = vand.u32 4294901760, %v165_v54  ;;  %v621_v4 = vpack.c.bf16 %v725_v18, %v723_v17  ;;  %v623_v6 = vpack.c.bf16 %v731_v21, %v727_v19 }
  0x10   :  { %642 = vmatprep.subr.bf16.mxu0 %v641_v55  ;;  %v160_v62 = vand.u32 4294901760, %v159_v58  ;;  %v171_v63 = vsub.f32 %v755_v34, %v170_v59  ;;  %v643_v0 = vpack.c.bf16 %v170_v59, %v158_v51  ;;  %497 = vmatprep.mubr.f32.mxu0 %v666_v3  ;;  %v625_v7 = vpack.c.bf16 %v739_v24, %v735_v23 }
  0x11   :  { %120 = vmatmul.mubr.f32.vlgmr.msra.gmra.mrb[0].mxu1 %v119_v60  ;;  %v617_v1 = vpack.c.bf16 %v166_v61, %v154_v57  ;;  %v627_v8 = vpack.c.bf16 %v755_v34, %v753_v33  ;;  %v28_v9 = vlaneseq }
  0x12   :  { %616 = vmatpush1.bf16.msra.mxu1 %v615_v56  ;;  %v172_v2 = vand.u32 4294901760, %v171_v63  ;;  %230 = vmatprep.mubr.f32.mxu1 %v666_v3 }
  0x13   :  { %618 = vmatprep.subr.bf16.mxu1 %v617_v1  ;;  %644 = vmatpush1.bf16.msra.mxu0 %v643_v0  ;;  %v29_v10 = vshrl.u32 %v28_v9, 7  ;;  %v588_v18 = vand.u32 127, %v28_v9 }
  0x14   :  { %v619_v5 = vpack.c.bf16 %v172_v2, %v160_v62  ;;  %646 = vmatprep.subr.bf16.mxu0 %v721_v16 }
  0x15   :  { %v30_v11 = vsub.s32 0, %v29_v10  ;;  %v34_v13 = vsub.s32 1, %v29_v10  ;;  %vm593_vm1 = vcmp.ge.s32.totalorder %v588_v18, 32  ;;  %vm594_vm2 = vcmp.lt.s32.totalorder %v588_v18, 48 }
  0x16   :  { %620 = vmatpush1.bf16.msra.mxu1 %v619_v5  ;;  %499 = vmatmul.mubr.f32.vlgmr.msra.gmra.mrb[0].mxu0 %v744_v28  ;;  %vm595_vm3 = vmand %vm593_vm1, %vm594_vm2  ;;  %vm597_vm4 = vcmp.lt.s32.totalorder %v588_v18, 16 }
  0x17   :  { %622 = vmatprep.subr.bf16.mxu1 %v621_v4  ;;  %648 = vmatpush1.bf16.msra.mxu0 %v729_v20  ;;  %v31_v14 = vrot.slane %v26_v12, %v30_v11  ;;  %v35_v16 = vrot.slane %v26_v12, %v34_v13  ;;  %v596_v29 = vsel %vm595_vm3, 1e-06, %v666_v3 }
  0x18   :  { %650 = vmatprep.subr.bf16.mxu0 %v733_v22  ;;  %577 = vmatprep.mubr.f32.mxu0 %v666_v3 }
  0x19   :  { %232 = vmatmul.mubr.f32.vlgmr.msra.gmra.mrb[0].mxu1 %v744_v28 }
  0x1a   :  { %624 = vmatpush1.bf16.msra.mxu1 %v623_v6  ;;  %318 = vmatprep.mubr.f32.mxu1 %v666_v3 }
  0x1b   :  { %626 = vmatprep.subr.bf16.mxu1 %v625_v7  ;;  %652 = vmatpush1.bf16.msra.mxu0 %v751_v32 }
  0x1e   :  { %628 = vmatpush1.bf16.msra.mxu1 %v627_v8  ;;  %579 = vmatmul.mubr.f32.vlgmr.msra.gmra.mrb[0].mxu0 %v744_v28 }
  0x21   :  { %321 = vmatmul.mubr.f32.vlgmr.msra.gmra.mrb[0].mxu1 %v116_v36 }
  0xf1   :  { %v580_v15 = vpop.f32.mrb[0].mxu0 }
  0xf2   :  { %v582_v17 = vpop.f32.mrb[1].mxu0 }
  0xf4   :  { %v322_v19 = vpop.f32.mrb[0].mxu1 }
  0xf5   :  { %v653_v20 = vadd.f32 %v322_v19, %v31_v14  ;;  %v324_v21 = vpop.f32.mrb[1].mxu1 }
  0xf6   :  { %v655_v22 = vadd.f32 %v324_v21, %v35_v16 }
  0xf7   :  { %v654_v23 = vadd.f32 %v653_v20, %v580_v15 }
  0xf8   :  { %v656_v24 = vadd.f32 %v655_v22, %v582_v17 }
  0xf9   :  { %v585_v27 = vmax.f32 %v654_v23, 0.0 }
  0xfa   :  { %v586_v25 = vmax.f32 %v656_v24, 0.0 }
  0xfb   :  { %v598_v31 = vadd.f32 %v596_v29, %v585_v27 }
  0xfc   :  { %v589_v28 = vadd.f32 1e-06, %v586_v25 }
  0xfe   :  { %v591_v30 = vmul.f32 %v590_v26, %v589_v28 }
 0x100   :  { %v592_v32 = vadd.f32 %v591_v30, %v585_v27 }
 0x102   :  { %v599_v33 = vsel %vm597_vm4, %v592_v32, %v598_v31 }
 0x103   :  { %600 = vst [vmem:[%s806_s4] sm:$0xff] %v599_v33 }

</bundles_post_ra>
